<compile_context>
chip_gen: v6e
topology: v6e:2x2x1
jax: 0.10.0
libtpu: 0.0.40
codegen_flags: <defaults>
</compile_context>

<pallas_src>
import jax
import jax.numpy as jnp
from jax.experimental import pallas as pl
from jax.experimental.pallas import tpu as pltpu


# ---------------------------------------------------------------------------
# Template-side precompute (plain XLA, runs once, off the batch path):
#   WM = W @ ((templates @ W)^T @ labels)   : (D, C)
# ---------------------------------------------------------------------------
def _template_precompute(template_batch, template_labels, proj_weight):
    w_bf = proj_weight.astype(jnp.bfloat16)
    tpl_bf = template_batch.astype(jnp.bfloat16)
    lab_bf = template_labels.astype(jnp.bfloat16)
    # h_t = templates @ W : (T, D), bf16 operands, f32 accumulation.
    h_t = jnp.dot(tpl_bf, w_bf, preferred_element_type=jnp.float32)
    # M = h_t^T @ labels : (D, C) — contract T on dim 0 of both, no explicit .T.
    m = jax.lax.dot_general(
        h_t.astype(jnp.bfloat16), lab_bf,
        dimension_numbers=(((0,), (0,)), ((), ())),
        preferred_element_type=jnp.float32)
    # WM = W @ M : (D, C).
    wm = jnp.dot(w_bf, m.astype(jnp.bfloat16), preferred_element_type=jnp.float32)
    # Single rounding of the fused "weight" matrix to bf16 for the MXU fast path.
    return wm.astype(jnp.bfloat16)


# ---------------------------------------------------------------------------
# Batch-path kernel, tiled over B (parallel grid axis):
#   out = sigmoid((x @ WM) * (1 / temperature))
# ---------------------------------------------------------------------------
def _batch_scale_kernel(temp_ref, x_ref, wm_ref, out_ref):
    # Cast the streamed tile to bf16 after DMA (no standalone convert pass in HLO).
    x_bf = x_ref[...].astype(jnp.bfloat16)
    # (tile_b, D) x (D, C) — bf16 operands, f32 MXU accumulation.
    logits = jnp.dot(x_bf, wm_ref[...], preferred_element_type=jnp.float32)
    # One scalar reciprocal + VPU broadcast multiply (no per-element divide).
    # TODO(synk): PyTorch applies no clamp either; a calibrated temperature near 0
    # would saturate/NaN — clamp upstream if that can happen.
    inv_t = 1.0 / temp_ref[0]
    out_ref[...] = jax.nn.sigmoid(logits * inv_t).astype(out_ref.dtype)


# ---------------------------------------------------------------------------
# Wrapper mirroring AlignmentTemperatureScaler.forward
# ---------------------------------------------------------------------------
def alignment_temperature_scaler_forward(batch, template_batch, template_labels,
                                         proj_weight, temperature, *,
                                         tile_b=512, out_dtype=jnp.float32):
    B, D = batch.shape
    T, _ = template_batch.shape
    _, C = template_labels.shape

    # ---- Stage 1: (D, C) fused template/label/weight matrix, computed once. ----
    wm = _template_precompute(template_batch, template_labels, proj_weight)

    # Pad the output lane dimension to a multiple of 128 (lane-dense stores).
    c_pad = pl.cdiv(C, 128) * 128
    if c_pad != C:
        wm = jnp.pad(wm, ((0, 0), (0, c_pad - C)))

    # ---- Batch tile selection (big tiles; >=2 grid steps when B allows). ----
    b_cap = pl.cdiv(B, 128) * 128                  # minimal padded batch
    tb = max(128, (int(tile_b) // 128) * 128)      # multiple of 128 (256 fills v6e MXU)
    tb = min(tb, b_cap)
    if b_cap // tb < 2 and b_cap >= 256:           # v7x: keep both TensorCores busy
        tb = max(128, ((b_cap // 2) // 128) * 128)
    b_pad = pl.cdiv(B, tb) * tb
    x = batch if b_pad == B else jnp.pad(batch, ((0, b_pad - B), (0, 0)))
    grid = (b_pad // tb,)

    # WM is constant across the grid: single-buffer it (reclaims VMEM on v7x).
    try:
        wm_spec = pl.BlockSpec((D, c_pad), lambda i: (0, 0),
                               pipeline_mode=pl.Buffered(1))
    except Exception:  # older JAX without pipeline_mode / Buffered(1): fall back.
        wm_spec = pl.BlockSpec((D, c_pad), lambda i: (0, 0))

    x_itemsize = jnp.dtype(x.dtype).itemsize
    out_itemsize = jnp.dtype(out_dtype).itemsize

    # Explicit VMEM budget (default scoped limit is only 16 MiB on v5e).
    vmem_needed = (2 * tb * D * x_itemsize          # x tile, double-buffered
                   + 2 * tb * c_pad * out_itemsize  # out tile, double-buffered
                   + D * c_pad * 2)                 # WM, single-buffered bf16
    vmem_limit = int(min(max(4 * vmem_needed, 8 << 20), 64 << 20))

    flops = 2 * b_pad * D * c_pad
    bytes_accessed = (b_pad * D * x_itemsize        # x
                      + D * c_pad * 2               # WM (bf16)
                      + b_pad * c_pad * out_itemsize
                      + 4)                          # temperature
    cost = pl.CostEstimate(flops=flops, transcendentals=b_pad * c_pad,
                           bytes_accessed=bytes_accessed)

    out = pl.pallas_call(
        _batch_scale_kernel,
        out_shape=jax.ShapeDtypeStruct((b_pad, c_pad), out_dtype),
        grid_spec=pltpu.PrefetchScalarGridSpec(
            num_scalar_prefetch=0,
            grid=grid,
            in_specs=[
                # Learned temperature: (1,) scalar in SMEM, same block every step.
                pl.BlockSpec((1,), lambda i: (0,),
                             memory_space=pltpu.MemorySpace.SMEM),
                # Batch tile, streamed / double-buffered over the parallel axis.
                pl.BlockSpec((tb, D), lambda i: (i, 0)),
                # Fused weight matrix: constant block index -> VMEM-resident.
                wm_spec,
            ],
            out_specs=pl.BlockSpec((tb, c_pad), lambda i: (i, 0)),
        ),
        compiler_params=pltpu.CompilerParams(
            dimension_semantics=("parallel",),
            vmem_limit_bytes=vmem_limit),
        cost_estimate=cost,
    )(temperature, x, wm)

    if b_pad != B or c_pad != C:
        out = out[:B, :C]
    return out


# ---------------------------------------------------------------------------
# References for correctness checking
# ---------------------------------------------------------------------------
def _reference_forward_matched(batch, template_batch, template_labels,
                               proj_weight, temperature):
    """Plain-JAX reference using the same precision / associativity as the kernel."""
    wm = _template_precompute(template_batch, template_labels, proj_weight)
    logits = jnp.dot(batch.astype(jnp.bfloat16), wm,
                     preferred_element_type=jnp.float32)
    return jax.nn.sigmoid(logits * (1.0 / temperature[0]))


def _reference_forward_f32(batch, template_batch, template_labels,
                           proj_weight, temperature):
    """Full-f32, original-associativity reference (loose check)."""
    h_x = batch @ proj_weight
    h_t = template_batch @ proj_weight
    logits = (h_x @ h_t.T) @ template_labels
    return jax.nn.sigmoid(logits / temperature[0])


if __name__ == "__main__":
    # Small deterministic shapes; B chosen so padding AND a >=2-step parallel
    # B-grid are both exercised (B=192 -> b_pad=256, two 128-row tiles).
    B, D, T, C = 192, 128, 8, 128

    key = jax.random.PRNGKey(0)
    k1, k2, k3, k4 = jax.random.split(key, 4)

    batch = jax.random.normal(k1, (B, D), dtype=jnp.float32)
    template_batch = jax.random.normal(k2, (T, D), dtype=jnp.float32)
    # Soft one-hot-ish template labels in [0, 1].
    template_labels = jax.nn.softmax(
        jax.random.normal(k3, (T, C), dtype=jnp.float32), axis=-1)

    # Deterministic parameter init: small projection weight, temperature = 1.5
    # (matches nn.Parameter(torch.ones(1) * 1.5)).
    proj_weight = jax.random.normal(k4, (D, D), dtype=jnp.float32) * (1.0 / jnp.sqrt(D))
    temperature = jnp.ones((1,), dtype=jnp.float32) * 1.5

    out = alignment_temperature_scaler_forward(
        batch, template_batch, template_labels, proj_weight, temperature)
    out = jax.block_until_ready(out)

    ref_matched = _reference_forward_matched(
        batch, template_batch, template_labels, proj_weight, temperature)
    ref_f32 = _reference_forward_f32(
        batch, template_batch, template_labels, proj_weight, temperature)

    assert out.shape == (B, C)
    # Tight check vs a reference doing identical bf16/f32 math.
    assert jnp.allclose(out, ref_matched, atol=2e-3, rtol=0.0), \
        "mismatch vs matched-precision reference"
    # Loose check vs the original full-f32 formulation (bf16 MXU operands +
    # reassociation loosen the tolerance; outputs are post-sigmoid in [0, 1]).
    assert jnp.allclose(out, ref_f32, atol=5e-2, rtol=0.0), \
        "mismatch vs f32 reference"

    print("KERNEL_OK")
</pallas_src>

<mosaic_0001>
module attributes {stable_mosaic.version = 11 : i64} {
  func.func @_batch_scale_kernel(%arg0: i32, %arg1: memref<1xf32, #tpu.memory_space<smem>>, %arg2: memref<128x128xf32, #tpu.memory_space<vmem>>, %arg3: memref<128x128xbf16, #tpu.memory_space<vmem>>, %arg4: memref<128x128xf32, #tpu.memory_space<vmem>>) attributes {dimension_semantics = [#tpu.dimension_semantics<parallel>], iteration_bounds = array<i64: 2>, scalar_prefetch = 0 : i64, scratch_operands = 0 : i64, tpu.core_type = #tpu.core_type<tc>, window_params = [{transform_indices = @transform_0, window_bounds = array<i64: 1>}, {transform_indices = @transform_1, window_bounds = array<i64: 128, 128>}, {pipeline_mode = #tpu.pipeline_mode<synchronous>, transform_indices = @transform_2, window_bounds = array<i64: 128, 128>}, {transform_indices = @transform_3, window_bounds = array<i64: 128, 128>}]} {
    %c0 = arith.constant 0 : index
    %c0_0 = arith.constant 0 : index
    %0 = vector.load %arg2[%c0, %c0_0] : memref<128x128xf32, #tpu.memory_space<vmem>>, vector<128x128xf32>
    %1 = arith.truncf %0 : vector<128x128xf32> to vector<128x128xbf16>
    %c0_1 = arith.constant 0 : index
    %c0_2 = arith.constant 0 : index
    %2 = vector.load %arg3[%c0_1, %c0_2] : memref<128x128xbf16, #tpu.memory_space<vmem>>, vector<128x128xbf16>
    %cst = arith.constant dense<0.000000e+00> : vector<128x128xf32>
    %3 = tpu.matmul %1, %2, %cst {dimension_numbers = #tpu.dot_dimension_numbers<[1], [0], [0], [1], [0, 0, 1, 1], [], []>} : vector<128x128xbf16>, vector<128x128xbf16>, vector<128x128xf32> -> vector<128x128xf32>
    %c0_3 = arith.constant 0 : index
    %4 = memref.load %arg1[%c0_3] : memref<1xf32, #tpu.memory_space<smem>>
    %cst_4 = arith.constant 1.000000e+00 : f32
    %5 = arith.divf %cst_4, %4 : f32
    %6 = vector.broadcast %5 : f32 to vector<128x128xf32>
    %7 = arith.mulf %3, %6 : vector<128x128xf32>
    %8 = arith.negf %7 : vector<128x128xf32>
    %9 = math.exp %8 : vector<128x128xf32>
    %cst_5 = arith.constant 1.000000e+00 : f32
    %10 = vector.broadcast %cst_5 : f32 to vector<128x128xf32>
    %11 = arith.addf %10, %9 : vector<128x128xf32>
    %12 = arith.divf %10, %11 : vector<128x128xf32>
    %c0_6 = arith.constant 0 : index
    %c0_7 = arith.constant 0 : index
    %13 = vector.load %arg4[%c0_6, %c0_7] : memref<128x128xf32, #tpu.memory_space<vmem>>, vector<128x128xf32>
    tpu.vector_store %arg4[%c0_6, %c0_7], %12 {strides = array<i32>} : memref<128x128xf32, #tpu.memory_space<vmem>>, vector<128x128xf32>,
    return
  }
  func.func @transform_0(%arg0: i32) -> i32 {
    %c0_i32 = arith.constant 0 : i32
    %c0_i32_0 = arith.constant 0 : i32
    return %c0_i32 : i32
  }
  func.func @transform_1(%arg0: i32) -> (i32, i32) {
    %c0_i32 = arith.constant 0 : i32
    %c0_i32_0 = arith.constant 0 : i32
    return %arg0, %c0_i32 : i32, i32
  }
  func.func @transform_2(%arg0: i32) -> (i32, i32) {
    %c0_i32 = arith.constant 0 : i32
    %c0_i32_0 = arith.constant 0 : i32
    %c0_i32_1 = arith.constant 0 : i32
    return %c0_i32, %c0_i32_0 : i32, i32
  }
  func.func @transform_3(%arg0: i32) -> (i32, i32) {
    %c0_i32 = arith.constant 0 : i32
    %c0_i32_0 = arith.constant 0 : i32
    return %arg0, %c0_i32 : i32, i32
  }
}

</mosaic_0001>

<bundles_post_ra>
// kernel: tpu_custom_call.1
= control target key start
LH: loop header
LB: loop body
LE: loop exit
PB: predicated region body
PF: predicated region fallthrough
CT: control target
= control target key end

     0   :  { %s1242_s0 = inlined_call_operand.<no memory space> [shape: f32[1], index: 0, kind: input, shape index: {}]   ;;  %s1243_s1 = inlined_call_operand.hbm [shape: f32[256,128], index: 1, kind: input, shape index: {}]   ;;  %s1244_s2 = inlined_call_operand.hbm [shape: bf16[128,128], index: 2, kind: input, shape index: {}]   ;;  %s1245_s3 = inlined_call_operand.hbm [shape: f32[256,128], index: 3, kind: output, shape index: {}]  }
   0x1   :  { %8 = sst [smem:[#allocation2]] %s1242_s0 }
   0x2   :  { %9 = vsyncpa [#allocation4], 0 }
   0x3   :  { %11 = vsyncpa [#allocation4 + $0x1], 0 }
   0x4   :  { %12 = vsyncpa [#allocation7], 0 }
   0x5   :  { %13 = vsyncpa [#allocation5], 0 }
   0x6   :  { %15 = vsyncpa [#allocation5 + $0x1], 0  ;;  %s1024_s14 = smov 0   ;;  %s1026_s15 = smov 0  }
   0x7   :  { %s1028_s16 = smov 0   ;;  %s1030_s17 = smov 0  }
   0x8 LB: > { %s1045_s0 = sadd.s32 4294967295, %s990_s17   ;;  %s623_s18 = sadd.s32 4294967294, %s990_s17   ;;  %s990_s17 = sphi %s1030_s17, %s1267_s17   ;;  %s986_s16 = sphi %s1028_s16, %s1266_s16   ;;  %s982_s15 = sphi %s1026_s15, %s1265_s15   ;;  %s978_s14 = sphi %s1024_s14, %s1264_s14  }
   0x9   : > { %p62_p0 = scmp.ne.s32.totalorder %s982_s15, %s978_s14  ;;  %p1246_p1 = scmp.eq.s32.totalorder %s1045_s0, 0 }
   0xa   : > { %p113_p3 = scmp.eq.s32.totalorder %s623_s18, 1  ;;  %p624_p5 = scmp.ge.s32.totalorder %s990_s17, 1 }
   0xb   : > { %p1054_p4 = por %p1246_p1, %p62_p0  ;;  %p120_p7 = scmp.lt.s32.totalorder %s990_s17, 3 }
   0xc   : > { %p1059_p6 = por %p113_p3, %p62_p0  ;;  %s992_s22 = smov [#allocation6]  }
   0xd   : > { %s1250_s19 = scalar_select %p1054_p4, 1, 0 }
   0xe   : > { %s1251_s20 = scalar_select %p1059_p6, 1, 0 }
   0xf   : > { %p1064_p8 = pnand %p624_p5, %p120_p7  ;;  %s135_s23 = sshll.u32 %s992_s22, 4  ;;  %s136_s23 = int_to_ptr.vmem [resolvable:$true] %s135_s23 }
  0x10   : > { %s1078_s25 = sadd.s32 1, %s990_s17   ;;  %s49_s26 = sadd.s32 1, %s986_s16 }
  0x11   : > { %s1252_s21 = scalar_select %p1064_p8, 1, 0 }
  0x12   : > { %p739_p9 = pneg %p1064_p8  ;;  %s46_s27 = ssub.s32 %s990_s17, %s1078_s25 }
  0x13   : > { %s879_s28 = scalar_lea.vmem %s136_s23, 1024  ;;  %p887_p5 = scmp.lt.s32.totalorder %s136_s23, %s136_s23 }
  0x14   : > { %p1073_p11 = pnand %p739_p9, %p1246_p1  ;;  %p880_p13 = scmp.ne.s32.totalorder %s136_s23, %s879_s28 }
  0x15   : > { %p888_p7 = scmp.lt.s32.totalorder %s879_s28, %s879_s28 }
  0x16   : > { %p870_p12 = pneg %p1073_p11 }
  0x17   : > { %p889_p10 = por %p888_p7, %p887_p5 }
  0x18   : > { %p882_p0 = pnand %p880_p13, %p870_p12 }
  0x1a   : > { %p883_p3 = pneg %p882_p0 }
  0x1c   : > { %p890_p2 = pnand %p889_p10, %p883_p3 }
  0x1e   : > { %893 = shalt.err (!%p890_p2)
}
  0x1f   : > { %s993_s29 = smov 64   ;;  %s994_s30 = smov 4  }
  0x20   : > { %742 = dma.hbm_to_vmem [thread:$0]  (!%p1073_p11), %s1244_s2, 1024, %s136_s23, [#allocation7], %s993_s29, %s993_s29, %s994_s30  }
  0x21   : > { %p47_p9 = scmp.eq.s32.totalorder %s46_s27, 0  ;;  %p56_p12 = scmp.ne.s32.totalorder %s986_s16, %s982_s15 }
  0x22   : > { %p57_p10 = scmp.eq.s32.totalorder %s990_s17, 0  ;;  %p752_p2 = scmp.lt.s32.totalorder %s990_s17, 2 }
  0x23   : > { %s1095_s6 = scalar_select %p47_p9, %s986_s16, %s49_s26  }
  0x24   : > { %p58_p13 = por %p57_p10, %p56_p12  ;;  %p1254_p0 = scmp.eq.s32.totalorder %s1045_s0, 1 }
  0x25   : > { %s149_s8 = sand.u32 1, %s986_s16   ;;  %s663_s9 = sshll.u32 %s990_s17, 11 }
  0x26   : > { %p1099_p3 = por %p1254_p0, %p56_p12  ;;  %s627_s10 = sshll.u32 %s149_s8, 7 }
  0x27   : > { %s1108_s13 = scalar_lea.hbm %s1243_s1, %s663_s9  ;;  %s153_s18 = scalar_lea.vmem [#allocation3], %s627_s10 }
  0x28   : > { %s1255_s7 = scalar_select %p1099_p3, 1, 0 }
  0x29   : > { %s160_s22 = sshll.u32 %s153_s18, 4  ;;  %p1110_p11 = pnand %p752_p2, %p58_p13  ;;  %s1114_s22 = int_to_ptr.vmem [resolvable:$true] %s160_s22 }
  0x2a   : > { %s1116_s24 = scalar_lea.sflag [#allocation4], %s149_s8  ;;  %s894_s26 = scalar_lea.hbm %s1108_s13, 2048 }
  0x2b   : > { %p895_p5 = scmp.ne.s32.totalorder %s1108_s13, %s894_s26  ;;  %p896_p7 = pneg %p1110_p11 }
  0x2c   : > { %s899_s29 = scalar_lea.hbm %s1243_s1, 4096  ;;  %p900_p10 = scmp.lt.s32.totalorder %s1108_s13, %s1243_s1 }
  0x2d   : > { %p897_p9 = pnand %p896_p7, %p895_p5  ;;  %p901_p2 = scmp.lt.s32.totalorder %s899_s29, %s894_s26 }
  0x2f   : > { %p898_p12 = pneg %p897_p9  ;;  %p902_p13 = por %p901_p2, %p900_p10 }
  0x31   : > { %p903_p0 = pnand %p902_p13, %p898_p12 }
  0x33   : > { %906 = shalt.err (!%p903_p0)
}
  0x34   : > { %s907_s5 = scalar_lea.vmem %s1114_s22, 2048  ;;  %s995_s8 = smov [#allocation3]  }
  0x35   : > { %p908_p1 = scmp.ne.s32.totalorder %s1114_s22, %s907_s5  ;;  %s912_s9 = sshll.u32 %s995_s8, 4  ;;  %s913_s9 = int_to_ptr.vmem [resolvable:$false] %s912_s9 }
  0x36   : > { %s914_s10 = scalar_lea.vmem %s913_s9, 4096  ;;  %p915_p9 = scmp.lt.s32.totalorder %s1114_s22, %s913_s9 }
  0x37   : > { %p910_p6 = pnand %p908_p1, %p896_p7  ;;  %p916_p3 = scmp.lt.s32.totalorder %s914_s10, %s907_s5 }
  0x39   : > { %p911_p5 = pneg %p910_p6  ;;  %p917_p4 = por %p916_p3, %p915_p9 }
  0x3b   : > { %p918_p8 = pnand %p917_p4, %p911_p5 }
  0x3d   : > { %921 = shalt.err (!%p918_p8)
}
  0x3e   : > { %s996_s11 = smov 128   ;;  %s997_s12 = smov 8  }
  0x3f   : > { %746 = dma.hbm_to_vmem [thread:$0]  (!%p1110_p11), %s1108_s13, 2048, %s1114_s22, %s1116_s24, %s996_s11, %s996_s11, %s997_s12  }
  0x40   : > { %p1257_p1 = scmp.ne.s32.totalorder %s1252_s21, 0 }
  0x41   : > { %s1140_s18 = sand.u32 (!%p1257_p1), 1, %s982_s15   ;;  %p1258_p4 = scmp.ne.s32.totalorder (!%p1257_p1), %s1250_s19, 0 }
  0x42   : > { %172 = sbr.rel (%p1257_p1) target bundleno = 364 (0x16c), region = 32  ;;  %s631_s26 = sshll.u32 (!%p1257_p1), %s1140_s18, 7 }
  0x43   : > { %s175_s27 = scalar_lea.sflag (!%p1257_p1), [#allocation4], %s1140_s18  ;;  %s1146_s28 = scalar_lea.vmem (!%p1257_p1), [#allocation3], %s631_s26 }
  0x47   : > { %965 = dma.done.wait (%p1258_p4), %s175_s27, 2048  }
  0x48   : > { %967 = vsyncadd (%p1258_p4), %s175_s27, 4294965248  ;;  %p1259_p6 = scmp.eq.s32.totalorder %s1045_s0, 0 }
  0x4a   : > { %969 = dma.done.wait (%p1259_p6), [#allocation7], 1024   ;;  %p1260_p8 = pmov %p1259_p6 }
  0x4b   : > { %s393_s21 = sld [smem:[#allocation2]]  ;;  %v794_v0 = vld [vmem:[#allocation6 + $0x38] sm:$0xff]   ;;  %v795_v2 = vld [vmem:[#allocation6 + $0x30] sm:$0xff]   ;;  %v796_v3 = vld [vmem:[#allocation6 + $0x28] sm:$0xff]   ;;  %s1174_s13 = scalar_lea.vmem [#allocation8], %s631_s26 }
  0x4c   : > { %971 = vsyncadd (%p1260_p8), [#allocation7], 4294966272  ;;  %681 = vmatprep.subr.bf16.mxu0 %v794_v0  ;;  %713 = vmatprep.subr.bf16.mxu1 %v794_v0  ;;  %v797_v4 = vld [vmem:[#allocation6 + $0x20] sm:$0xff]   ;;  %v209_v6 = vld [vmem:[%s1146_s28 + $0x8] sm:$0xff]  ;;  %s664_s22 = sshll.u32 %s1045_s0, 11  ;;  %s540_s23 = sshll.u32 %s1174_s13, 4  ;;  %s1196_s23 = int_to_ptr.vmem [resolvable:$true] %s540_s23 }
  0x4d   : > { %682 = vmatpush3.bf16.msra.mxu0 %v794_v0  ;;  %721 = vmatpush3.bf16.msra.mxu1 %v794_v0  ;;  %v208_v5 = vld [vmem:[%s1146_s28] sm:$0xff]  ;;  %v217_v9 = vld [vmem:[%s1146_s28 + $0x48] sm:$0xff]  ;;  %v798_v11 = vld [vmem:[#allocation6 + $0x18] sm:$0xff]   ;;  %s1194_s30 = scalar_lea.hbm %s1245_s3, %s664_s22  ;;  %s527_s0 = scalar_lea.sflag [#allocation5], %s1140_s18 }
  0x4e   : > { %683 = vmatprep.subr.bf16.mxu0 %v795_v2  ;;  %714 = vmatprep.subr.bf16.mxu1 %v795_v2  ;;  %v216_v7 = vld [vmem:[%s1146_s28 + $0x40] sm:$0xff]  ;;  %v224_v8 = vpack.c.bf16 %v209_v6, %v208_v5  ;;  %v799_v13 = vld [vmem:[#allocation6 + $0x10] sm:$0xff]   ;;  %v800_v14 = vld [vmem:[#allocation6 + $0x8] sm:$0xff]   ;;  %s922_s4 = scalar_lea.vmem %s1196_s23, 2048  ;;  %p1261_p11 = scmp.ne.s32.totalorder %s1255_s7, 0 }
  0x4f   : > { %v228_v10 = vpack.c.bf16 %v217_v9, %v216_v7  ;;  %v801_v15 = vld [vmem:[#allocation6] sm:$0xff]   ;;  %v210_v16 = vld [vmem:[%s1146_s28 + $0x10] sm:$0xff]  ;;  %v211_v17 = vld [vmem:[%s1146_s28 + $0x18] sm:$0xff]  ;;  %p923_p3 = scmp.ne.s32.totalorder %s1196_s23, %s922_s4  ;;  %s998_s5 = smov [#allocation8]  }
  0x50   : > { %697 = vmatprep.mubr.bf16.mxu0 %v224_v8  ;;  %v218_v18 = vld [vmem:[%s1146_s28 + $0x50] sm:$0xff]  ;;  %v219_v19 = vld [vmem:[%s1146_s28 + $0x58] sm:$0xff]  ;;  %v212_v20 = vld [vmem:[%s1146_s28 + $0x20] sm:$0xff]  ;;  %v225_v24 = vpack.c.bf16 %v211_v17, %v210_v16  ;;  %s926_s8 = sshll.u32 %s998_s5, 4  ;;  %s927_s8 = int_to_ptr.vmem [resolvable:$false] %s926_s8 }
  0x51   : > { %v394_v1 = vstv %s393_s21  ;;  %684 = vmatpush3.bf16.msra.mxu0 %v795_v2  ;;  %722 = vmatpush3.bf16.msra.mxu1 %v795_v2  ;;  %v213_v21 = vld [vmem:[%s1146_s28 + $0x28] sm:$0xff]  ;;  %v220_v22 = vld [vmem:[%s1146_s28 + $0x60] sm:$0xff]  ;;  %v229_v25 = vpack.c.bf16 %v219_v19, %v218_v18  ;;  %v214_v28 = vld [vmem:[%s1146_s28 + $0x30] sm:$0xff]  ;;  %p924_p7 = pnand %p923_p3, %p1261_p11  ;;  %s928_s9 = scalar_lea.vmem %s927_s8, 4096 }
  0x52   : > { %802 = vrcp.f32 %v394_v1  ;;  %685 = vmatprep.subr.bf16.mxu0 %v796_v3  ;;  %715 = vmatprep.subr.bf16.mxu1 %v796_v3  ;;  %v221_v23 = vld [vmem:[%s1146_s28 + $0x68] sm:$0xff]  ;;  %v226_v26 = vpack.c.bf16 %v213_v21, %v212_v20  ;;  %v215_v29 = vld [vmem:[%s1146_s28 + $0x38] sm:$0xff]  ;;  %v222_v30 = vld [vmem:[%s1146_s28 + $0x70] sm:$0xff]  ;;  %p929_p10 = scmp.lt.s32.totalorder %s1196_s23, %s927_s8  ;;  %p930_p2 = scmp.lt.s32.totalorder %s928_s9, %s922_s4 }
  0x53   : > { %705 = vmatprep.mubr.bf16.mxu1 %v228_v10  ;;  %v230_v27 = vpack.c.bf16 %v221_v23, %v220_v22  ;;  %v223_v31 = vld [vmem:[%s1146_s28 + $0x78] sm:$0xff]  ;;  %v227_v32 = vpack.c.bf16 %v215_v29, %v214_v28  ;;  %p925_p12 = pneg %p924_p7 }
  0x54   : > { %v231_v33 = vpack.c.bf16 %v223_v31, %v222_v30  ;;  %p931_p13 = por %p930_p2, %p929_p10 }
  0x55   : > { %686 = vmatpush3.bf16.msra.mxu0 %v796_v3  ;;  %723 = vmatpush3.bf16.msra.mxu1 %v796_v3 }
  0x56   : > { %687 = vmatprep.subr.bf16.mxu0 %v797_v4  ;;  %716 = vmatprep.subr.bf16.mxu1 %v797_v4  ;;  %p932_p0 = pnand %p931_p13, %p925_p12 }
  0x59   : > { %688 = vmatpush3.bf16.msra.mxu0 %v797_v4  ;;  %724 = vmatpush3.bf16.msra.mxu1 %v797_v4 }
  0x5a   : > { %689 = vmatprep.subr.bf16.mxu0 %v798_v11  ;;  %717 = vmatprep.subr.bf16.mxu1 %v798_v11 }
  0x5d   : > { %690 = vmatpush3.bf16.msra.mxu0 %v798_v11  ;;  %725 = vmatpush3.bf16.msra.mxu1 %v798_v11 }
  0x5e   : > { %691 = vmatprep.subr.bf16.mxu0 %v799_v13  ;;  %718 = vmatprep.subr.bf16.mxu1 %v799_v13 }
  0x5f   : > { %v803_v12 = vpop.eup %802 }
  0x60   : > { %729 = vpush %v803_v12 }
  0x61   : > { %692 = vmatpush3.bf16.msra.mxu0 %v799_v13  ;;  %726 = vmatpush3.bf16.msra.mxu1 %v799_v13 }
  0x62   : > { %693 = vmatprep.subr.bf16.mxu0 %v800_v14  ;;  %719 = vmatprep.subr.bf16.mxu1 %v800_v14 }
  0x65   : > { %694 = vmatpush3.bf16.msra.mxu0 %v800_v14  ;;  %727 = vmatpush3.bf16.msra.mxu1 %v800_v14 }
  0x66   : > { %695 = vmatprep.subr.bf16.mxu0 %v801_v15  ;;  %720 = vmatprep.subr.bf16.mxu1 %v801_v15 }
  0x69   : > { %696 = vmatpush3.bf16.msra.mxu0 %v801_v15  ;;  %728 = vmatpush3.bf16.msra.mxu1 %v801_v15 }
  0x6c   : > { %698 = vmatmul.mubr.bf16.vlgmr.msra.gmra.mxu0 %v225_v24  ;;  %706 = vmatmul.mubr.bf16.vlgmr.msra.gmra.mxu1 %v229_v25 }
  0x6d   : > { %701 = vmatprep.mubr.bf16.mxu0 %v226_v26  ;;  %709 = vmatprep.mubr.bf16.mxu1 %v230_v27 }
  0x74   : > { %702 = vmatmul.mubr.bf16.gmra.mxu0 %v227_v32  ;;  %710 = vmatmul.mubr.bf16.gmra.mxu1 %v231_v33 }
  0x91   : > { %s730_s19 = spop %729 }
  0x92   : > { %v397_v34 = vstv %s730_s19 }
 0x12c   : > { %v699_v35 = vpop.f32.mrf.mxu0  ;;  %v707_v36 = vpop.f32.mrf.mxu1 }
 0x12d   : > { %v400_v37 = vmul.f32 %v699_v35, %v397_v34  ;;  %v408_v38 = vmul.f32 %v707_v36, %v397_v34 }
 0x12e   : > { %v330_v39 = vpop.f32.mrf.mxu0  ;;  %v362_v40 = vpop.f32.mrf.mxu1 }
 0x12f   : > { %v644_v41 = vmul.f32 -1.442695, %v400_v37  ;;  %v652_v42 = vmul.f32 -1.442695, %v408_v38  ;;  %v398_v43 = vmul.f32 %v397_v34, %v330_v39  ;;  %v406_v44 = vmul.f32 %v397_v34, %v362_v40 }
 0x130   : > { %v700_v45 = vpop.f32.mrf.mxu0  ;;  %v708_v46 = vpop.f32.mrf.mxu1 }
 0x131   : > { %804 = vpow2.f32 %v644_v41  ;;  %v642_v47 = vmul.f32 -1.442695, %v398_v43  ;;  %v650_v48 = vmul.f32 -1.442695, %v406_v44  ;;  %v401_v49 = vmul.f32 %v700_v45, %v397_v34 }
 0x132   : > { %806 = vpow2.f32 %v652_v42  ;;  %v409_v50 = vmul.f32 %v708_v46, %v397_v34  ;;  %v333_v51 = vpop.f32.mrf.mxu0  ;;  %v365_v52 = vpop.f32.mrf.mxu1 }
 0x133   : > { %808 = vpow2.f32 %v642_v47  ;;  %v645_v53 = vmul.f32 -1.442695, %v401_v49  ;;  %v399_v54 = vmul.f32 %v397_v34, %v333_v51  ;;  %v407_v55 = vmul.f32 %v397_v34, %v365_v52 }
 0x134   : > { %810 = vpow2.f32 %v650_v48  ;;  %v653_v56 = vmul.f32 -1.442695, %v409_v50  ;;  %v703_v57 = vpop.f32.mrf.mxu0  ;;  %v711_v58 = vpop.f32.mrf.mxu1 }
 0x135   : > { %812 = vpow2.f32 %v645_v53  ;;  %v643_v59 = vmul.f32 -1.442695, %v399_v54  ;;  %v651_v60 = vmul.f32 -1.442695, %v407_v55  ;;  %v404_v61 = vmul.f32 %v703_v57, %v397_v34 }
 0x136   : > { %814 = vpow2.f32 %v653_v56  ;;  %v412_v62 = vmul.f32 %v711_v58, %v397_v34  ;;  %v346_v63 = vpop.f32.mrf.mxu0  ;;  %v378_v0 = vpop.f32.mrf.mxu1 }
 0x137   : > { %816 = vpow2.f32 %v643_v59  ;;  %v648_v1 = vmul.f32 -1.442695, %v404_v61  ;;  %v402_v2 = vmul.f32 %v397_v34, %v346_v63  ;;  %v410_v3 = vmul.f32 %v397_v34, %v378_v0 }
 0x138   : > { %818 = vpow2.f32 %v651_v60  ;;  %v656_v4 = vmul.f32 -1.442695, %v412_v62  ;;  %v704_v5 = vpop.f32.mrf.mxu0  ;;  %v712_v6 = vpop.f32.mrf.mxu1 }
 0x139   : > { %820 = vpow2.f32 %v648_v1  ;;  %v646_v7 = vmul.f32 -1.442695, %v402_v2  ;;  %v654_v8 = vmul.f32 -1.442695, %v410_v3  ;;  %v405_v9 = vmul.f32 %v704_v5, %v397_v34 }
 0x13a   : > { %822 = vpow2.f32 %v656_v4  ;;  %v413_v10 = vmul.f32 %v712_v6, %v397_v34  ;;  %v349_v11 = vpop.f32.mrf.mxu0  ;;  %v381_v12 = vpop.f32.mrf.mxu1 }
 0x13b   : > { %824 = vpow2.f32 %v646_v7  ;;  %v649_v13 = vmul.f32 -1.442695, %v405_v9  ;;  %v403_v14 = vmul.f32 %v397_v34, %v349_v11  ;;  %v411_v15 = vmul.f32 %v397_v34, %v381_v12 }
 0x13c   : > { %826 = vpow2.f32 %v654_v8  ;;  %v657_v16 = vmul.f32 -1.442695, %v413_v10 }
 0x13d   : > { %828 = vpow2.f32 %v649_v13  ;;  %v647_v17 = vmul.f32 -1.442695, %v403_v14  ;;  %v655_v18 = vmul.f32 -1.442695, %v411_v15 }
 0x13e   : > { %v805_v19 = vpop.eup %804  ;;  %830 = vpow2.f32 %v657_v16 }
 0x13f   : > { %v807_v20 = vpop.eup %806  ;;  %v464_v21 = vadd.f32 1.0, %v805_v19  ;;  %832 = vpow2.f32 %v647_v17 }
 0x140   : > { %v809_v22 = vpop.eup %808  ;;  %v472_v23 = vadd.f32 1.0, %v807_v20  ;;  %834 = vpow2.f32 %v655_v18 }
 0x141   : > { %v811_v24 = vpop.eup %810  ;;  %836 = vrcp.f32 %v464_v21  ;;  %v462_v25 = vadd.f32 1.0, %v809_v22 }
 0x142   : > { %v813_v26 = vpop.eup %812  ;;  %838 = vrcp.f32 %v472_v23  ;;  %v470_v27 = vadd.f32 1.0, %v811_v24 }
 0x143   : > { %v815_v28 = vpop.eup %814  ;;  %840 = vrcp.f32 %v462_v25  ;;  %v465_v29 = vadd.f32 1.0, %v813_v26 }
 0x144   : > { %v817_v30 = vpop.eup %816  ;;  %842 = vrcp.f32 %v470_v27  ;;  %v473_v31 = vadd.f32 1.0, %v815_v28 }
 0x145   : > { %v819_v32 = vpop.eup %818  ;;  %844 = vrcp.f32 %v465_v29  ;;  %v463_v33 = vadd.f32 1.0, %v817_v30 }
 0x146   : > { %v821_v34 = vpop.eup %820  ;;  %846 = vrcp.f32 %v473_v31  ;;  %v471_v35 = vadd.f32 1.0, %v819_v32 }
 0x147   : > { %v823_v36 = vpop.eup %822  ;;  %848 = vrcp.f32 %v463_v33  ;;  %v468_v37 = vadd.f32 1.0, %v821_v34 }
 0x148   : > { %v825_v38 = vpop.eup %824  ;;  %850 = vrcp.f32 %v471_v35  ;;  %v476_v39 = vadd.f32 1.0, %v823_v36 }
 0x149   : > { %v827_v40 = vpop.eup %826  ;;  %852 = vrcp.f32 %v468_v37  ;;  %v466_v41 = vadd.f32 1.0, %v825_v38 }
 0x14a   : > { %v829_v42 = vpop.eup %828  ;;  %854 = vrcp.f32 %v476_v39  ;;  %v474_v43 = vadd.f32 1.0, %v827_v40 }
 0x14b   : > { %v831_v44 = vpop.eup %830  ;;  %856 = vrcp.f32 %v466_v41  ;;  %v469_v45 = vadd.f32 1.0, %v829_v42 }
 0x14c   : > { %v833_v46 = vpop.eup %832  ;;  %858 = vrcp.f32 %v474_v43  ;;  %v477_v47 = vadd.f32 1.0, %v831_v44 }
 0x14d   : > { %v835_v48 = vpop.eup %834  ;;  %860 = vrcp.f32 %v469_v45  ;;  %v467_v49 = vadd.f32 1.0, %v833_v46 }
 0x14e   : > { %v837_v50 = vpop.eup %836  ;;  %862 = vrcp.f32 %v477_v47  ;;  %v475_v51 = vadd.f32 1.0, %v835_v48 }
 0x14f   : > { %v839_v52 = vpop.eup %838  ;;  %512 = vst [vmem:[%s1174_s13 + $0x10] sm:$0xff] %v837_v50  ;;  %864 = vrcp.f32 %v467_v49 }
 0x150   : > { %v841_v53 = vpop.eup %840  ;;  %520 = vst [vmem:[%s1174_s13 + $0x50] sm:$0xff] %v839_v52  ;;  %866 = vrcp.f32 %v475_v51 }
 0x151   : > { %v843_v54 = vpop.eup %842  ;;  %510 = vst [vmem:[%s1174_s13] sm:$0xff] %v841_v53 }
 0x152   : > { %v845_v55 = vpop.eup %844  ;;  %518 = vst [vmem:[%s1174_s13 + $0x40] sm:$0xff] %v843_v54 }
 0x153   : > { %v847_v56 = vpop.eup %846  ;;  %513 = vst [vmem:[%s1174_s13 + $0x18] sm:$0xff] %v845_v55 }
 0x154   : > { %v849_v57 = vpop.eup %848  ;;  %521 = vst [vmem:[%s1174_s13 + $0x58] sm:$0xff] %v847_v56 }
 0x155   : > { %v851_v58 = vpop.eup %850  ;;  %511 = vst [vmem:[%s1174_s13 + $0x8] sm:$0xff] %v849_v57 }
 0x156   : > { %v853_v59 = vpop.eup %852  ;;  %519 = vst [vmem:[%s1174_s13 + $0x48] sm:$0xff] %v851_v58 }
 0x157   : > { %v855_v60 = vpop.eup %854  ;;  %516 = vst [vmem:[%s1174_s13 + $0x30] sm:$0xff] %v853_v59 }
 0x158   : > { %v857_v61 = vpop.eup %856  ;;  %524 = vst [vmem:[%s1174_s13 + $0x70] sm:$0xff] %v855_v60 }
 0x159   : > { %v859_v62 = vpop.eup %858  ;;  %514 = vst [vmem:[%s1174_s13 + $0x20] sm:$0xff] %v857_v61 }
 0x15a   : > { %v861_v63 = vpop.eup %860  ;;  %522 = vst [vmem:[%s1174_s13 + $0x60] sm:$0xff] %v859_v62 }
 0x15b   : > { %v863_v0 = vpop.eup %862  ;;  %517 = vst [vmem:[%s1174_s13 + $0x38] sm:$0xff] %v861_v63 }
 0x15c   : > { %v865_v1 = vpop.eup %864  ;;  %525 = vst [vmem:[%s1174_s13 + $0x78] sm:$0xff] %v863_v0 }
 0x15d   : > { %v867_v2 = vpop.eup %866  ;;  %515 = vst [vmem:[%s1174_s13 + $0x28] sm:$0xff] %v865_v1 }
 0x15e   : > { %523 = vst [vmem:[%s1174_s13 + $0x68] sm:$0xff] %v867_v2 }
 0x15f   : > { %935 = shalt.err (!%p932_p0)
}
 0x160   : > { %s936_s10 = scalar_lea.hbm %s1194_s30, 2048  ;;  %s940_s26 = scalar_lea.hbm %s1245_s3, 4096 }
 0x161   : > { %p937_p5 = scmp.ne.s32.totalorder %s1194_s30, %s936_s10  ;;  %p941_p4 = scmp.lt.s32.totalorder %s1194_s30, %s1245_s3 }
 0x162   : > { %p942_p6 = scmp.lt.s32.totalorder %s940_s26, %s936_s10 }
 0x163   : > { %p938_p9 = pnand %p937_p5, %p1261_p11 }
 0x164   : > { %p943_p8 = por %p942_p6, %p941_p4 }
 0x165   : > { %p939_p1 = pneg %p938_p9 }
 0x167   : > { %p944_p3 = pnand %p943_p8, %p939_p1 }
 0x169   : > { %947 = shalt.err (!%p944_p3)
}
 0x16a   : > { %s999_s21 = smov 128   ;;  %s1000_s19 = smov 8  }
 0x16b   : > { %737 = dma.vmem_to_hbm [thread:$0]  (%p1261_p11), %s1196_s23, 2048, %s1194_s30, %s527_s0, %s999_s21, %s999_s21, %s1000_s19  }
 0x16c PF: > { %s555_s13 = sand.u32 1, %s978_s14   ;;  %p1262_p7 = scmp.ne.s32.totalorder %s1251_s20, 0 }
 0x16d   : > { %p1263_p12 = scmp.ge.s32.totalorder %s990_s17, 2  ;;  %s556_s22 = scalar_lea.sflag [#allocation5], %s555_s13 }
 0x16f   : > { %p748_p10 = pnand %p1263_p12, %p1262_p7 }
 0x171   : > { %p749_p2 = pneg %p748_p10 }
 0x173   : > { %973 = dma.done.wait (%p749_p2), %s556_s22, 2048  }
 0x174   : > { %975 = vsyncadd (%p749_p2), %s556_s22, 4294965248  ;;  %p18_p13 = scmp.ge.s32.totalorder %s1078_s25, 4   ;;  %s1264_s14 = smov %s982_s15 }
 0x175   : > { %s1265_s15 = smov %s986_s16  ;;  %s1266_s16 = smov %s1095_s6 }
 0x176   : > { %s1267_s17 = smov %s1078_s25  ;;  %20 = sbr.rel (!%p18_p13) target bundleno = 8 (0x8), region = 81 }
 0x17b   :  { %561 = vsyncpa [#allocation4], 1 }
 0x17c   :  { %563 = vsyncpa [#allocation4 + $0x1], 1 }
 0x17d   :  { %564 = vsyncpa [#allocation7], 1 }
 0x17e   :  { %565 = vsyncpa [#allocation5], 1 }
 0x17f   :  { %567 = vsyncpa [#allocation5 + $0x1], 1 }

</bundles_post_ra>
